<compile_context>
chip_gen: v7x
topology: tpu7x:2x2x1
jax: 0.10.0
libtpu: 0.0.40
codegen_flags: <defaults>
</compile_context>

<pallas_src>
import functools
import math

import jax
import jax.numpy as jnp
from jax.experimental import pallas as pl
from jax.experimental.pallas import tpu as pltpu


_LANE = 128
_TARGET_BLOCK_BYTES = 2 * 1024 * 1024      # per-block DMA target (in == out bytes)
_VMEM_CEILING = 48 * 1024 * 1024           # headroom under v7x's 64 MiB physical VMEM


def _coalesce(shape, dims):
    """Merge runs of input dims that stay adjacent & in-order in the output.

    Returns (merged_input_shape, sigma) such that
      transpose(reshape(x, merged_input_shape), sigma)
    equals transpose(x, dims); sigma is irreducible (no remaining runs).
    """
    groups = [[dims[0]]]
    for d in dims[1:]:
        if d == groups[-1][-1] + 1:
            groups[-1].append(d)
        else:
            groups.append([d])
    # `groups` is in OUTPUT order; sort by first input dim to get input order.
    input_order = sorted(range(len(groups)), key=lambda gi: groups[gi][0])
    pos_in_input = {gi: k for k, gi in enumerate(input_order)}
    merged_in_shape = tuple(
        math.prod(shape[d] for d in groups[gi]) for gi in input_order)
    sigma = tuple(pos_in_input[gi] for gi in range(len(groups)))
    return merged_in_shape, sigma


def _block_kernel(induced_perm, x_ref, o_ref):
    x = x_ref[...]
    if induced_perm == tuple(range(len(induced_perm))):
        o_ref[...] = x          # pure block copy; the index maps do the permute
    else:
        # Common case after coalescing: a (batched) 2-D sublane/lane transpose (XLU).
        # TODO(synk): irreducible permutations mixing 3-4 distinct minor dims rely
        # on Mosaic's general transpose lowering (tiles are kept small for them).
        o_ref[...] = jnp.transpose(x, induced_perm)


@functools.partial(jax.jit, static_argnums=1)
def permute(x, dims):
    """Pallas TPU equivalent of torch.Tensor.permute(*dims)."""
    n = x.ndim
    dims = tuple(int(d) % n for d in dims)
    if sorted(dims) != list(range(n)):
        raise ValueError(f"invalid permutation {dims} for rank-{n} input")
    out_full_shape = tuple(x.shape[d] for d in dims)
    if dims == tuple(range(n)):
        return x                                          # identity permute

    # 1) Coalesce adjacent runs: free reshapes outside the kernel.
    merged_in_shape, sigma = _coalesce(x.shape, dims)
    m = len(sigma)
    merged_out_shape = tuple(merged_in_shape[d] for d in sigma)
    x_m = jnp.reshape(x, merged_in_shape)

    itemsize = jnp.dtype(x.dtype).itemsize
    s_pack = max(8, 32 // itemsize)           # f32: 8, bf16: 16, int8/fp8: 32

    inv_sigma = [0] * m
    for j, d in enumerate(sigma):
        inv_sigma[d] = j

    # 2) Roles of the minor dims.
    in_sub, in_lane = m - 2, m - 1
    out_sub_src, out_lane_src = sigma[m - 2], sigma[m - 1]
    lane_role = {in_lane, out_lane_src}                   # must be 128-multiples
    minor = lane_role | {in_sub, out_sub_src}             # must obey (8,128)/full

    if len(minor) <= 2:
        lane_cap, sub_cap = 512, 512                      # ~1 MiB f32 transpose tile
    else:
        # Rare irreducible case with 3-4 distinct minor dims: keep every tile
        # small so double-buffered in+out blocks stay inside the VMEM budget.
        lane_cap, sub_cap = 128, s_pack

    def _minor_tile(d):
        extent = merged_in_shape[d]
        if d in lane_role:
            cap, align = lane_cap, _LANE
        else:
            cap, align = sub_cap, s_pack
        if extent <= cap:
            return extent                                  # full extent: always legal
        return max(align, (cap // align) * align)          # aligned tile, edge handled

    tiles = [1] * m
    for d in minor:
        tiles[d] = _minor_tile(d)

    # 3) Batch leading dims the permutation leaves in place into the block until
    #    the per-step DMA reaches the byte target (fattens DMAs, amortizes the
    #    per-grid-step overhead).  These dims never touch the last-two of either
    #    block, so they carry no (8,128) constraint.
    p = 0
    while p < m and sigma[p] == p:
        p += 1
    prefix_dims = [d for d in range(p) if d not in minor]
    block_bytes = math.prod(tiles) * itemsize
    for d in reversed(prefix_dims):
        if block_bytes >= _TARGET_BLOCK_BYTES:
            break
        grow = min(merged_in_shape[d],
                   max(1, _TARGET_BLOCK_BYTES // block_bytes))
        tiles[d] = grow
        block_bytes *= grow

    squeezed = [tiles[d] == 1 and d not in minor for d in range(m)]

    in_block = tuple(pl.Squeezed() if squeezed[d] else tiles[d]
                     for d in range(m))
    out_block = tuple(pl.Squeezed() if squeezed[sigma[j]] else tiles[sigma[j]]
                      for j in range(m))

    # Permutation the kernel applies to the non-squeezed block dims.
    kept_in = [d for d in range(m) if not squeezed[d]]
    kept_out = [sigma[j] for j in range(m) if not squeezed[sigma[j]]]
    induced = tuple(kept_in.index(d) for d in kept_out)

    # 4) Grid axis j walks OUTPUT dim j; the last (fastest-varying) axis walks
    #    the output minor dim so HBM write-back stays sequential.
    grid = tuple(pl.cdiv(merged_in_shape[sigma[j]], tiles[sigma[j]])
                 for j in range(m))

    def in_index_map(*g):
        return tuple(g[inv_sigma[d]] for d in range(m))

    def out_index_map(*g):
        return tuple(g)

    # Double-buffered in + out blocks, plus headroom; capped for v7x's 64 MiB.
    vmem_limit = int(min(_VMEM_CEILING,
                         max(16 * 1024 * 1024, 4 * block_bytes + (4 << 20))))

    out_m = pl.pallas_call(
        functools.partial(_block_kernel, induced),
        out_shape=jax.ShapeDtypeStruct(merged_out_shape, x.dtype),
        grid=grid,
        in_specs=[pl.BlockSpec(in_block, in_index_map)],
        out_specs=pl.BlockSpec(out_block, out_index_map),
        compiler_params=pltpu.CompilerParams(
            dimension_semantics=("parallel",) * m,
            vmem_limit_bytes=vmem_limit),
    )(x_m)

    # 5) Undo the coalescing on the output side (free reshape).
    return jnp.reshape(out_m, out_full_shape)


class Permute:
    """Mirror of the PyTorch nn.Module."""

    def __init__(self, dims):
        self.dims = tuple(dims)

    def __call__(self, x):
        return permute(x, self.dims)


if __name__ == "__main__":
    key = jax.random.PRNGKey(0)

    cases = [
        ((2, 4, 16, 16),  (0, 2, 3, 1), jnp.float32),   # NCHW -> NHWC
        ((2, 16, 16, 4),  (0, 3, 1, 2), jnp.float32),   # NHWC -> NCHW
        ((2, 8, 32),      (0, 2, 1),    jnp.float32),   # [B, N, C] -> [B, C, N]
        ((2, 8, 32),      (0, 2, 1),    jnp.bfloat16),  # dtype-packed sublanes
        ((640, 256),      (1, 0),       jnp.float32),   # 2-D transpose, multi-tile grid
        ((3, 2, 16, 128), (1, 0, 3, 2), jnp.float32),   # squeezed grid dims + transpose
        ((2, 600, 32),    (0, 2, 1),    jnp.float32),   # non-divisible -> edge blocks
    ]

    keys = jax.random.split(key, len(cases))
    for (shape, dims, dtype), k in zip(cases, keys):
        x = jax.random.normal(k, shape, dtype=jnp.float32).astype(dtype)
        y = jax.block_until_ready(Permute(dims)(x))
        ref = jnp.transpose(x, dims)
        assert y.shape == ref.shape, (dims, y.shape, ref.shape)
        assert y.dtype == ref.dtype, (dims, y.dtype, ref.dtype)
        assert jnp.array_equal(y, ref), f"mismatch for shape={shape} dims={dims}"

    print("KERNEL_OK")
</pallas_src>

<mosaic_0001>
module attributes {stable_mosaic.version = 11 : i64} {
  func.func @_block_kernel(%arg0: i32, %arg1: i32, %arg2: i32, %arg3: memref<2x4x256xf32, #tpu.memory_space<vmem>>, %arg4: memref<2x256x4xf32, #tpu.memory_space<vmem>>) attributes {dimension_semantics = [#tpu.dimension_semantics<parallel>, #tpu.dimension_semantics<parallel>, #tpu.dimension_semantics<parallel>], iteration_bounds = array<i64: 1, 1, 1>, scalar_prefetch = 0 : i64, scratch_operands = 0 : i64, tpu.core_type = #tpu.core_type<tc>, window_params = [{transform_indices = @transform_0, window_bounds = array<i64: 2, 4, 256>}, {transform_indices = @transform_1, window_bounds = array<i64: 2, 256, 4>}]} {
    %c0 = arith.constant 0 : index
    %c0_0 = arith.constant 0 : index
    %c0_1 = arith.constant 0 : index
    %0 = vector.load %arg3[%c0, %c0_0, %c0_1] : memref<2x4x256xf32, #tpu.memory_space<vmem>>, vector<2x4x256xf32>
    %1 = tpu.transpose %0, [0, 2, 1] : vector<2x4x256xf32> -> vector<2x256x4xf32>
    %c0_2 = arith.constant 0 : index
    %c0_3 = arith.constant 0 : index
    %c0_4 = arith.constant 0 : index
    %2 = vector.load %arg4[%c0_2, %c0_3, %c0_4] : memref<2x256x4xf32, #tpu.memory_space<vmem>>, vector<2x256x4xf32>
    tpu.vector_store %arg4[%c0_2, %c0_3, %c0_4], %1 {strides = array<i32>} : memref<2x256x4xf32, #tpu.memory_space<vmem>>, vector<2x256x4xf32>,
    return
  }
  func.func @transform_0(%arg0: i32, %arg1: i32, %arg2: i32) -> (i32, i32, i32) {
    %c0_i32 = arith.constant 0 : i32
    return %arg0, %arg2, %arg1 : i32, i32, i32
  }
  func.func @transform_1(%arg0: i32, %arg1: i32, %arg2: i32) -> (i32, i32, i32) {
    %c0_i32 = arith.constant 0 : i32
    return %arg0, %arg1, %arg2 : i32, i32, i32
  }
}

</mosaic_0001>

<bundles_post_ra>
// kernel: permute.1
= control target key start
LH: loop header
LB: loop body
LE: loop exit
PB: predicated region body
PF: predicated region fallthrough
CT: control target
= control target key end

     0   :  { %vm144_vm0 = vcmask 31744   ;;  %s488_s0 = inlined_call_operand.vmem [shape: f32[2,4,256], index: 0, kind: input, shape index: {}]   ;;  %s489_s1 = inlined_call_operand.vmem [shape: f32[2,256,4], index: 1, kind: output, shape index: {}]  }
   0x1   :  { %v9_v0 = vld [vmem:[%s488_s0 + $0x8] sm:$0xff]  ;;  %v8_v1 = vld [vmem:[%s488_s0] sm:$0xff] }
   0x2   :  { %80 = vxpose.xlu1.b32.start.end [1/1] (short) %v9_v0, 128  ;;  %16 = vxpose.xlu0.b32.start.end [1/1] (short) %v8_v1, 128  ;;  %v13_v2 = vcombine.high %v9_v0, %v9_v0  ;;  %v12_v3 = vcombine.high %v8_v1, %v8_v1 }
  0x3f   :  { %112 = vxpose.xlu1.b32.start.end [1/1] (short) %v13_v2, 128  ;;  %48 = vxpose.xlu0.b32.start.end [1/1] (short) %v12_v3, 128 }
  0x82   :  { %v96_v4 = vpop.trf.xlu1  ;;  %v32_v5 = vpop.trf.xlu0 }
  0x83   :  { %177 = vst.msk [vmem:[%s489_s1 + $0x100] sm:$0xff] %vm144_vm0, %v96_v4  ;;  %145 = vst.msk [vmem:[%s489_s1] sm:$0xff] %vm144_vm0, %v32_v5 }
  0x86   :  { %v97_v6 = vpop.trf.xlu1  ;;  %v33_v7 = vpop.trf.xlu0 }
  0x87   :  { %178 = vst.msk [vmem:[%s489_s1 + $0x108] sm:$0xff] %vm144_vm0, %v97_v6  ;;  %146 = vst.msk [vmem:[%s489_s1 + $0x8] sm:$0xff] %vm144_vm0, %v33_v7 }
  0x8a   :  { %v98_v8 = vpop.trf.xlu1  ;;  %v34_v9 = vpop.trf.xlu0 }
  0x8b   :  { %179 = vst.msk [vmem:[%s489_s1 + $0x110] sm:$0xff] %vm144_vm0, %v98_v8  ;;  %147 = vst.msk [vmem:[%s489_s1 + $0x10] sm:$0xff] %vm144_vm0, %v34_v9 }
  0x8e   :  { %v99_v10 = vpop.trf.xlu1  ;;  %v35_v11 = vpop.trf.xlu0 }
  0x8f   :  { %180 = vst.msk [vmem:[%s489_s1 + $0x118] sm:$0xff] %vm144_vm0, %v99_v10  ;;  %148 = vst.msk [vmem:[%s489_s1 + $0x18] sm:$0xff] %vm144_vm0, %v35_v11 }
  0x92   :  { %v100_v12 = vpop.trf.xlu1  ;;  %v36_v13 = vpop.trf.xlu0 }
  0x93   :  { %181 = vst.msk [vmem:[%s489_s1 + $0x120] sm:$0xff] %vm144_vm0, %v100_v12  ;;  %149 = vst.msk [vmem:[%s489_s1 + $0x20] sm:$0xff] %vm144_vm0, %v36_v13 }
  0x96   :  { %v101_v14 = vpop.trf.xlu1  ;;  %v37_v15 = vpop.trf.xlu0 }
  0x97   :  { %182 = vst.msk [vmem:[%s489_s1 + $0x128] sm:$0xff] %vm144_vm0, %v101_v14  ;;  %150 = vst.msk [vmem:[%s489_s1 + $0x28] sm:$0xff] %vm144_vm0, %v37_v15 }
  0x9a   :  { %v102_v16 = vpop.trf.xlu1  ;;  %v38_v17 = vpop.trf.xlu0 }
  0x9b   :  { %183 = vst.msk [vmem:[%s489_s1 + $0x130] sm:$0xff] %vm144_vm0, %v102_v16  ;;  %151 = vst.msk [vmem:[%s489_s1 + $0x30] sm:$0xff] %vm144_vm0, %v38_v17 }
  0x9e   :  { %v103_v18 = vpop.trf.xlu1  ;;  %v39_v19 = vpop.trf.xlu0 }
  0x9f   :  { %184 = vst.msk [vmem:[%s489_s1 + $0x138] sm:$0xff] %vm144_vm0, %v103_v18  ;;  %152 = vst.msk [vmem:[%s489_s1 + $0x38] sm:$0xff] %vm144_vm0, %v39_v19 }
  0xa2   :  { %v104_v20 = vpop.trf.xlu1  ;;  %v40_v21 = vpop.trf.xlu0 }
  0xa3   :  { %185 = vst.msk [vmem:[%s489_s1 + $0x140] sm:$0xff] %vm144_vm0, %v104_v20  ;;  %153 = vst.msk [vmem:[%s489_s1 + $0x40] sm:$0xff] %vm144_vm0, %v40_v21 }
  0xa6   :  { %v105_v22 = vpop.trf.xlu1  ;;  %v41_v23 = vpop.trf.xlu0 }
  0xa7   :  { %186 = vst.msk [vmem:[%s489_s1 + $0x148] sm:$0xff] %vm144_vm0, %v105_v22  ;;  %154 = vst.msk [vmem:[%s489_s1 + $0x48] sm:$0xff] %vm144_vm0, %v41_v23 }
  0xaa   :  { %v106_v24 = vpop.trf.xlu1  ;;  %v42_v25 = vpop.trf.xlu0 }
  0xab   :  { %187 = vst.msk [vmem:[%s489_s1 + $0x150] sm:$0xff] %vm144_vm0, %v106_v24  ;;  %155 = vst.msk [vmem:[%s489_s1 + $0x50] sm:$0xff] %vm144_vm0, %v42_v25 }
  0xae   :  { %v107_v26 = vpop.trf.xlu1  ;;  %v43_v27 = vpop.trf.xlu0 }
  0xaf   :  { %188 = vst.msk [vmem:[%s489_s1 + $0x158] sm:$0xff] %vm144_vm0, %v107_v26  ;;  %156 = vst.msk [vmem:[%s489_s1 + $0x58] sm:$0xff] %vm144_vm0, %v43_v27 }
  0xb2   :  { %v108_v28 = vpop.trf.xlu1  ;;  %v44_v29 = vpop.trf.xlu0 }
  0xb3   :  { %189 = vst.msk [vmem:[%s489_s1 + $0x160] sm:$0xff] %vm144_vm0, %v108_v28  ;;  %157 = vst.msk [vmem:[%s489_s1 + $0x60] sm:$0xff] %vm144_vm0, %v44_v29 }
  0xb6   :  { %v109_v30 = vpop.trf.xlu1  ;;  %v45_v31 = vpop.trf.xlu0 }
  0xb7   :  { %190 = vst.msk [vmem:[%s489_s1 + $0x168] sm:$0xff] %vm144_vm0, %v109_v30  ;;  %158 = vst.msk [vmem:[%s489_s1 + $0x68] sm:$0xff] %vm144_vm0, %v45_v31 }
  0xba   :  { %v110_v32 = vpop.trf.xlu1  ;;  %v46_v33 = vpop.trf.xlu0 }
  0xbb   :  { %191 = vst.msk [vmem:[%s489_s1 + $0x170] sm:$0xff] %vm144_vm0, %v110_v32  ;;  %159 = vst.msk [vmem:[%s489_s1 + $0x70] sm:$0xff] %vm144_vm0, %v46_v33 }
  0xbe   :  { %v111_v34 = vpop.trf.xlu1  ;;  %v47_v35 = vpop.trf.xlu0 }
  0xbf   :  { %192 = vst.msk [vmem:[%s489_s1 + $0x178] sm:$0xff] %vm144_vm0, %v111_v34  ;;  %160 = vst.msk [vmem:[%s489_s1 + $0x78] sm:$0xff] %vm144_vm0, %v47_v35 }
  0xc2   :  { %v128_v36 = vpop.trf.xlu1  ;;  %v64_v37 = vpop.trf.xlu0 }
  0xc3   :  { %193 = vst.msk [vmem:[%s489_s1 + $0x180] sm:$0xff] %vm144_vm0, %v128_v36  ;;  %161 = vst.msk [vmem:[%s489_s1 + $0x80] sm:$0xff] %vm144_vm0, %v64_v37 }
  0xc6   :  { %v129_v38 = vpop.trf.xlu1  ;;  %v65_v39 = vpop.trf.xlu0 }
  0xc7   :  { %194 = vst.msk [vmem:[%s489_s1 + $0x188] sm:$0xff] %vm144_vm0, %v129_v38  ;;  %162 = vst.msk [vmem:[%s489_s1 + $0x88] sm:$0xff] %vm144_vm0, %v65_v39 }
  0xca   :  { %v130_v40 = vpop.trf.xlu1  ;;  %v66_v41 = vpop.trf.xlu0 }
  0xcb   :  { %195 = vst.msk [vmem:[%s489_s1 + $0x190] sm:$0xff] %vm144_vm0, %v130_v40  ;;  %163 = vst.msk [vmem:[%s489_s1 + $0x90] sm:$0xff] %vm144_vm0, %v66_v41 }
  0xce   :  { %v131_v42 = vpop.trf.xlu1  ;;  %v67_v43 = vpop.trf.xlu0 }
  0xcf   :  { %196 = vst.msk [vmem:[%s489_s1 + $0x198] sm:$0xff] %vm144_vm0, %v131_v42  ;;  %164 = vst.msk [vmem:[%s489_s1 + $0x98] sm:$0xff] %vm144_vm0, %v67_v43 }
  0xd2   :  { %v132_v44 = vpop.trf.xlu1  ;;  %v68_v45 = vpop.trf.xlu0 }
  0xd3   :  { %197 = vst.msk [vmem:[%s489_s1 + $0x1a0] sm:$0xff] %vm144_vm0, %v132_v44  ;;  %165 = vst.msk [vmem:[%s489_s1 + $0xa0] sm:$0xff] %vm144_vm0, %v68_v45 }
  0xd6   :  { %v133_v46 = vpop.trf.xlu1  ;;  %v69_v47 = vpop.trf.xlu0 }
  0xd7   :  { %198 = vst.msk [vmem:[%s489_s1 + $0x1a8] sm:$0xff] %vm144_vm0, %v133_v46  ;;  %166 = vst.msk [vmem:[%s489_s1 + $0xa8] sm:$0xff] %vm144_vm0, %v69_v47 }
  0xda   :  { %v134_v48 = vpop.trf.xlu1  ;;  %v70_v49 = vpop.trf.xlu0 }
  0xdb   :  { %199 = vst.msk [vmem:[%s489_s1 + $0x1b0] sm:$0xff] %vm144_vm0, %v134_v48  ;;  %167 = vst.msk [vmem:[%s489_s1 + $0xb0] sm:$0xff] %vm144_vm0, %v70_v49 }
  0xde   :  { %v135_v50 = vpop.trf.xlu1  ;;  %v71_v51 = vpop.trf.xlu0 }
  0xdf   :  { %200 = vst.msk [vmem:[%s489_s1 + $0x1b8] sm:$0xff] %vm144_vm0, %v135_v50  ;;  %168 = vst.msk [vmem:[%s489_s1 + $0xb8] sm:$0xff] %vm144_vm0, %v71_v51 }
  0xe2   :  { %v136_v52 = vpop.trf.xlu1  ;;  %v72_v53 = vpop.trf.xlu0 }
  0xe3   :  { %201 = vst.msk [vmem:[%s489_s1 + $0x1c0] sm:$0xff] %vm144_vm0, %v136_v52  ;;  %169 = vst.msk [vmem:[%s489_s1 + $0xc0] sm:$0xff] %vm144_vm0, %v72_v53 }
  0xe6   :  { %v137_v54 = vpop.trf.xlu1  ;;  %v73_v55 = vpop.trf.xlu0 }
  0xe7   :  { %202 = vst.msk [vmem:[%s489_s1 + $0x1c8] sm:$0xff] %vm144_vm0, %v137_v54  ;;  %170 = vst.msk [vmem:[%s489_s1 + $0xc8] sm:$0xff] %vm144_vm0, %v73_v55 }
  0xea   :  { %v138_v56 = vpop.trf.xlu1  ;;  %v74_v57 = vpop.trf.xlu0 }
  0xeb   :  { %203 = vst.msk [vmem:[%s489_s1 + $0x1d0] sm:$0xff] %vm144_vm0, %v138_v56  ;;  %171 = vst.msk [vmem:[%s489_s1 + $0xd0] sm:$0xff] %vm144_vm0, %v74_v57 }
  0xee   :  { %v139_v58 = vpop.trf.xlu1  ;;  %v75_v59 = vpop.trf.xlu0 }
  0xef   :  { %204 = vst.msk [vmem:[%s489_s1 + $0x1d8] sm:$0xff] %vm144_vm0, %v139_v58  ;;  %172 = vst.msk [vmem:[%s489_s1 + $0xd8] sm:$0xff] %vm144_vm0, %v75_v59 }
  0xf2   :  { %v140_v60 = vpop.trf.xlu1  ;;  %v76_v61 = vpop.trf.xlu0 }
  0xf3   :  { %205 = vst.msk [vmem:[%s489_s1 + $0x1e0] sm:$0xff] %vm144_vm0, %v140_v60  ;;  %173 = vst.msk [vmem:[%s489_s1 + $0xe0] sm:$0xff] %vm144_vm0, %v76_v61 }
  0xf6   :  { %v141_v62 = vpop.trf.xlu1  ;;  %v77_v63 = vpop.trf.xlu0 }
  0xf7   :  { %206 = vst.msk [vmem:[%s489_s1 + $0x1e8] sm:$0xff] %vm144_vm0, %v141_v62  ;;  %174 = vst.msk [vmem:[%s489_s1 + $0xe8] sm:$0xff] %vm144_vm0, %v77_v63 }
  0xfa   :  { %v142_v0 = vpop.trf.xlu1  ;;  %v78_v1 = vpop.trf.xlu0 }
  0xfb   :  { %207 = vst.msk [vmem:[%s489_s1 + $0x1f0] sm:$0xff] %vm144_vm0, %v142_v0  ;;  %175 = vst.msk [vmem:[%s489_s1 + $0xf0] sm:$0xff] %vm144_vm0, %v78_v1 }
  0xfe   :  { %v143_v2 = vpop.trf.xlu1  ;;  %v79_v3 = vpop.trf.xlu0 }
  0xff   :  { %208 = vst.msk [vmem:[%s489_s1 + $0x1f8] sm:$0xff] %vm144_vm0, %v143_v2  ;;  %176 = vst.msk [vmem:[%s489_s1 + $0xf8] sm:$0xff] %vm144_vm0, %v79_v3 }

</bundles_post_ra>
